<compile_context>
chip_gen: v7x
topology: tpu7x:2x2x1
jax: 0.10.0
libtpu: 0.0.40
codegen_flags: <defaults>
</compile_context>

<pallas_src>
import jax
import jax.numpy as jnp
from jax.experimental import pallas as pl
from jax.experimental.pallas import tpu as pltpu

D_MODEL = 128   # config.d_model
D_FF = 256      # config.d_ff
LN_EPS = 1e-5   # nn.LayerNorm default eps (gamma=1, beta=0: LN is freshly built in forward)


def ffn_kernel(x_ref, w1_ref, w2_ref, o_ref):
    x = x_ref[...]                                           # (tm, d_model), input dtype
    # fc1 (no bias) + ReLU: bf16 operands -> MXU, f32 accumulate
    h = jnp.dot(x.astype(jnp.bfloat16), w1_ref[...],
                preferred_element_type=jnp.float32)
    h = jnp.maximum(h, 0.0)
    # fc2 (no bias): bf16 operands -> MXU, f32 accumulate
    y = jnp.dot(h.astype(jnp.bfloat16), w2_ref[...],
                preferred_element_type=jnp.float32)
    # residual add in f32
    z = y + x.astype(jnp.float32)
    # LayerNorm over d_model: one-pass stats (biased variance, eps inside rsqrt,
    # gamma=1, beta=0)
    mean = jnp.mean(z, axis=-1, keepdims=True)
    msq = jnp.mean(z * z, axis=-1, keepdims=True)
    var = jnp.maximum(msq - mean * mean, 0.0)
    o_ref[...] = ((z - mean) * jax.lax.rsqrt(var + LN_EPS)).astype(o_ref.dtype)


def _round_up(n, m):
    return ((n + m - 1) // m) * m


def poswise_ffn(x, w1, w2, *, tm=1024):
    """x: [batch, seq_len, d_model]; w1: [d_model, d_ff]; w2: [d_ff, d_model]."""
    B, S, D = x.shape
    d_ff = w1.shape[1]
    assert w1.shape == (D, d_ff) and w2.shape == (d_ff, D)
    assert D % 128 == 0 and d_ff % 128 == 0

    M = B * S
    x2 = x.reshape(M, D)

    # Effective row tile: as large as requested but no bigger than the
    # (8-aligned) row count; then pad rows up to a tile multiple.
    tm_eff = min(_round_up(tm, 8), _round_up(M, 8))
    M_pad = _round_up(M, tm_eff)
    if M_pad != M:
        x2 = jnp.pad(x2, ((0, M_pad - M), (0, 0)))

    # Weights cast to bf16 once (resident in VMEM; constant index map => no re-DMA).
    w1b = w1.astype(jnp.bfloat16)
    w2b = w2.astype(jnp.bfloat16)

    out2 = pl.pallas_call(
        ffn_kernel,
        out_shape=jax.ShapeDtypeStruct((M_pad, D), x.dtype),
        grid_spec=pltpu.PrefetchScalarGridSpec(
            num_scalar_prefetch=0,
            grid=(M_pad // tm_eff,),
            in_specs=[
                pl.BlockSpec((tm_eff, D), lambda i: (i, 0)),   # rows of x
                pl.BlockSpec((D, d_ff), lambda i: (0, 0)),     # full W1 (resident, bf16)
                pl.BlockSpec((d_ff, D), lambda i: (0, 0)),     # full W2 (resident, bf16)
            ],
            out_specs=pl.BlockSpec((tm_eff, D), lambda i: (i, 0)),
        ),
        compiler_params=pltpu.CompilerParams(
            dimension_semantics=("parallel",)),
    )(x2, w1b, w2b)

    if M_pad != M:
        out2 = out2[:M]
    return out2.reshape(B, S, D)


def poswise_ffn_ref(x, w1, w2):
    h = jnp.maximum(x @ w1, 0.0)
    z = h @ w2 + x
    mean = jnp.mean(z, axis=-1, keepdims=True)
    var = jnp.mean((z - mean) ** 2, axis=-1, keepdims=True)
    return (z - mean) * jax.lax.rsqrt(var + LN_EPS)


if __name__ == "__main__":
    key = jax.random.PRNGKey(0)
    kx, k1, k2, kx2 = jax.random.split(key, 4)

    B, S = 2, 8
    x = jax.random.normal(kx, (B, S, D_MODEL), dtype=jnp.float32)
    # Deterministic synthetic weights (PyTorch stores Linear weight as [out, in];
    # we keep them pre-transposed as [in, out] for x @ W).
    w1 = (jax.random.normal(k1, (D_MODEL, D_FF), dtype=jnp.float32)
          * (1.0 / jnp.sqrt(D_MODEL)))
    w2 = (jax.random.normal(k2, (D_FF, D_MODEL), dtype=jnp.float32)
          * (1.0 / jnp.sqrt(D_FF)))

    out = poswise_ffn(x, w1, w2)
    out = jax.block_until_ready(out)
    ref = poswise_ffn_ref(x, w1, w2)
    assert out.shape == (B, S, D_MODEL)
    # bf16 MXU operands with f32 accumulation -> slightly looser tolerance vs f32 ref.
    assert jnp.allclose(out, ref, atol=3e-2, rtol=3e-2)

    # Second small case with a row count that is not tile/8-aligned (exercises padding).
    B2, S2 = 3, 5
    x_odd = jax.random.normal(kx2, (B2, S2, D_MODEL), dtype=jnp.float32)
    out_odd = jax.block_until_ready(poswise_ffn(x_odd, w1, w2))
    ref_odd = poswise_ffn_ref(x_odd, w1, w2)
    assert out_odd.shape == (B2, S2, D_MODEL)
    assert jnp.allclose(out_odd, ref_odd, atol=3e-2, rtol=3e-2)

    print("KERNEL_OK")
</pallas_src>

<mosaic_0001>
module attributes {stable_mosaic.version = 11 : i64} {
  func.func @ffn_kernel(%arg0: i32, %arg1: memref<16x128xf32, #tpu.memory_space<vmem>>, %arg2: memref<128x256xbf16, #tpu.memory_space<vmem>>, %arg3: memref<256x128xbf16, #tpu.memory_space<vmem>>, %arg4: memref<16x128xf32, #tpu.memory_space<vmem>>) attributes {dimension_semantics = [#tpu.dimension_semantics<parallel>], iteration_bounds = array<i64: 1>, scalar_prefetch = 0 : i64, scratch_operands = 0 : i64, tpu.core_type = #tpu.core_type<tc>, window_params = [{transform_indices = @transform_0, window_bounds = array<i64: 16, 128>}, {pipeline_mode = #tpu.pipeline_mode<synchronous>, transform_indices = @transform_1, window_bounds = array<i64: 128, 256>}, {pipeline_mode = #tpu.pipeline_mode<synchronous>, transform_indices = @transform_2, window_bounds = array<i64: 256, 128>}, {transform_indices = @transform_3, window_bounds = array<i64: 16, 128>}]} {
    %c0 = arith.constant 0 : index
    %c0_0 = arith.constant 0 : index
    %0 = vector.load %arg1[%c0, %c0_0] : memref<16x128xf32, #tpu.memory_space<vmem>>, vector<16x128xf32>
    %1 = arith.truncf %0 : vector<16x128xf32> to vector<16x128xbf16>
    %c0_1 = arith.constant 0 : index
    %c0_2 = arith.constant 0 : index
    %2 = vector.load %arg2[%c0_1, %c0_2] : memref<128x256xbf16, #tpu.memory_space<vmem>>, vector<128x256xbf16>
    %cst = arith.constant dense<0.000000e+00> : vector<16x256xf32>
    %3 = tpu.matmul %1, %2, %cst {dimension_numbers = #tpu.dot_dimension_numbers<[1], [0], [0], [1], [0, 0, 1, 1], [], []>} : vector<16x128xbf16>, vector<128x256xbf16>, vector<16x256xf32> -> vector<16x256xf32>
    %cst_3 = arith.constant 0.000000e+00 : f32
    %4 = vector.broadcast %cst_3 : f32 to vector<16x256xf32>
    %5 = arith.maximumf %3, %4 : vector<16x256xf32>
    %6 = arith.truncf %5 : vector<16x256xf32> to vector<16x256xbf16>
    %c0_4 = arith.constant 0 : index
    %c0_5 = arith.constant 0 : index
    %7 = vector.load %arg3[%c0_4, %c0_5] : memref<256x128xbf16, #tpu.memory_space<vmem>>, vector<256x128xbf16>
    %cst_6 = arith.constant dense<0.000000e+00> : vector<16x128xf32>
    %8 = tpu.matmul %6, %7, %cst_6 {dimension_numbers = #tpu.dot_dimension_numbers<[1], [0], [0], [1], [0, 0, 1, 1], [], []>} : vector<16x256xbf16>, vector<256x128xbf16>, vector<16x128xf32> -> vector<16x128xf32>
    %9 = arith.addf %8, %0 : vector<16x128xf32>
    %cst_7 = arith.constant dense<0.000000e+00> : vector<16xf32>
    %10 = vector.multi_reduction <add>, %9, %cst_7 [1] : vector<16x128xf32> to vector<16xf32>
    %11 = vector.shape_cast %10 : vector<16xf32> to vector<16x1xf32>
    %cst_8 = arith.constant 1.280000e+02 : f32
    %12 = vector.broadcast %cst_8 : f32 to vector<16x1xf32>
    %13 = arith.divf %11, %12 : vector<16x1xf32>
    %14 = arith.mulf %9, %9 : vector<16x128xf32>
    %cst_9 = arith.constant dense<0.000000e+00> : vector<16xf32>
    %15 = vector.multi_reduction <add>, %14, %cst_9 [1] : vector<16x128xf32> to vector<16xf32>
    %16 = vector.shape_cast %15 : vector<16xf32> to vector<16x1xf32>
    %cst_10 = arith.constant 1.280000e+02 : f32
    %17 = vector.broadcast %cst_10 : f32 to vector<16x1xf32>
    %18 = arith.divf %16, %17 : vector<16x1xf32>
    %19 = arith.mulf %13, %13 : vector<16x1xf32>
    %20 = arith.subf %18, %19 : vector<16x1xf32>
    %cst_11 = arith.constant 0.000000e+00 : f32
    %21 = vector.broadcast %cst_11 : f32 to vector<16x1xf32>
    %22 = arith.maximumf %20, %21 : vector<16x1xf32>
    %23 = vector.broadcast %13 : vector<16x1xf32> to vector<16x128xf32>
    %24 = arith.subf %9, %23 : vector<16x128xf32>
    %cst_12 = arith.constant 9.99999974E-6 : f32
    %25 = vector.broadcast %cst_12 : f32 to vector<16x1xf32>
    %26 = arith.addf %22, %25 : vector<16x1xf32>
    %27 = math.rsqrt %26 : vector<16x1xf32>
    %28 = vector.broadcast %27 : vector<16x1xf32> to vector<16x128xf32>
    %29 = arith.mulf %24, %28 : vector<16x128xf32>
    %c0_13 = arith.constant 0 : index
    %c0_14 = arith.constant 0 : index
    %30 = vector.load %arg4[%c0_13, %c0_14] : memref<16x128xf32, #tpu.memory_space<vmem>>, vector<16x128xf32>
    tpu.vector_store %arg4[%c0_13, %c0_14], %29 {strides = array<i32>} : memref<16x128xf32, #tpu.memory_space<vmem>>, vector<16x128xf32>,
    return
  }
  func.func @transform_0(%arg0: i32) -> (i32, i32) {
    %c0_i32 = arith.constant 0 : i32
    %c0_i32_0 = arith.constant 0 : i32
    return %arg0, %c0_i32 : i32, i32
  }
  func.func @transform_1(%arg0: i32) -> (i32, i32) {
    %c0_i32 = arith.constant 0 : i32
    %c0_i32_0 = arith.constant 0 : i32
    %c0_i32_1 = arith.constant 0 : i32
    return %c0_i32, %c0_i32_0 : i32, i32
  }
  func.func @transform_2(%arg0: i32) -> (i32, i32) {
    %c0_i32 = arith.constant 0 : i32
    %c0_i32_0 = arith.constant 0 : i32
    %c0_i32_1 = arith.constant 0 : i32
    return %c0_i32, %c0_i32_0 : i32, i32
  }
  func.func @transform_3(%arg0: i32) -> (i32, i32) {
    %c0_i32 = arith.constant 0 : i32
    %c0_i32_0 = arith.constant 0 : i32
    return %arg0, %c0_i32 : i32, i32
  }
}

</mosaic_0001>

<bundles_post_ra>
// kernel: tpu_custom_call.1
= control target key start
LH: loop header
LB: loop body
LE: loop exit
PB: predicated region body
PF: predicated region fallthrough
CT: control target
= control target key end

     0   :  { %8 = vsyncpa [#allocation3], 0  ;;  %s717_s0 = inlined_call_operand.hbm [shape: f32[16,128], index: 0, kind: input, shape index: {}]   ;;  %s718_s1 = inlined_call_operand.hbm [shape: bf16[128,256], index: 1, kind: input, shape index: {}]   ;;  %s719_s2 = inlined_call_operand.hbm [shape: bf16[256,128], index: 2, kind: input, shape index: {}]   ;;  %s720_s3 = inlined_call_operand.hbm [shape: f32[16,128], index: 3, kind: output, shape index: {}]  }
   0x1   :  { %9 = vsyncpa [#allocation6], 0 }
   0x2   :  { %10 = vsyncpa [#allocation4], 0  ;;  %s624_s12 = smov [#allocation5]   ;;  %s625_s14 = smov [#allocation2]  }
   0x3   :  { %s28_s13 = sshll.u32 %s624_s12, 4  ;;  %s16_s15 = sshll.u32 %s625_s14, 4  ;;  %s29_s13 = int_to_ptr.vmem [resolvable:$true] %s28_s13  ;;  %s653_s15 = int_to_ptr.vmem [resolvable:$true] %s16_s15 }
   0x4   :  { %s530_s18 = scalar_lea.hbm %s718_s1, 2048 }
   0x5   :  { %p531_p0 = scmp.ne.s32.totalorder %s718_s1, %s530_s18  ;;  %p534_p1 = scmp.lt.u32.totalorder %s530_s18, %s718_s1 }
   0x7   :  { %p536_p2 = pnand %p534_p1, %p531_p0 }
   0x9   :  { %539 = shalt.err (!%p536_p2)
}
   0xa   :  { %s540_s23 = scalar_lea.vmem %s29_s13, 2048  ;;  %p545_p4 = scmp.lt.s32.totalorder %s29_s13, %s29_s13 }
   0xb   :  { %p541_p3 = scmp.ne.s32.totalorder %s29_s13, %s540_s23  ;;  %p546_p5 = scmp.lt.s32.totalorder %s540_s23, %s540_s23 }
   0xd   :  { %p547_p6 = por %p546_p5, %p545_p4 }
   0xf   :  { %p548_p7 = pnand %p547_p6, %p541_p3 }
  0x11   :  { %551 = shalt.err (!%p548_p7)
}
  0x12   :  { %s626_s24 = smov 128   ;;  %s627_s25 = smov 8  }
  0x13   :  { %34 = dma.hbm_to_vmem [thread:$0]  %s718_s1, 2048, %s29_s13, [#allocation6], %s626_s24, %s626_s24, %s627_s25  }
  0x14   :  { %s552_s30 = scalar_lea.hbm %s717_s0, 256 }
  0x15   :  { %p553_p8 = scmp.ne.s32.totalorder %s717_s0, %s552_s30  ;;  %p556_p9 = scmp.lt.u32.totalorder %s552_s30, %s717_s0 }
  0x17   :  { %p558_p10 = pnand %p556_p9, %p553_p8 }
  0x19   :  { %561 = shalt.err (!%p558_p10)
}
  0x1a   :  { %s562_s8 = scalar_lea.vmem %s653_s15, 256  ;;  %p567_p12 = scmp.lt.s32.totalorder %s653_s15, %s653_s15 }
  0x1b   :  { %p563_p11 = scmp.ne.s32.totalorder %s653_s15, %s562_s8  ;;  %p568_p13 = scmp.lt.s32.totalorder %s562_s8, %s562_s8 }
  0x1d   :  { %p569_p0 = por %p568_p13, %p567_p12 }
  0x1f   :  { %p570_p1 = pnand %p569_p0, %p563_p11 }
  0x21   :  { %573 = shalt.err (!%p570_p1)
}
  0x22   :  { %22 = dma.hbm_to_vmem [thread:$0]  %s717_s0, 256, %s653_s15, [#allocation3], %s626_s24, %s626_s24, %s627_s25  }
  0x23   :  { %s628_s10 = smov [#allocation7]   ;;  %s574_s14 = scalar_lea.hbm %s719_s2, 2048 }
  0x24   :  { %s40_s11 = sshll.u32 %s628_s10, 4  ;;  %p575_p2 = scmp.ne.s32.totalorder %s719_s2, %s574_s14  ;;  %s41_s11 = int_to_ptr.vmem [resolvable:$true] %s40_s11 }
  0x25   :  { %p578_p3 = scmp.lt.u32.totalorder %s574_s14, %s719_s2 }
  0x27   :  { %p580_p4 = pnand %p578_p3, %p575_p2 }
  0x29   :  { %583 = shalt.err (!%p580_p4)
}
  0x2a   :  { %s584_s20 = scalar_lea.vmem %s41_s11, 2048  ;;  %p589_p6 = scmp.lt.s32.totalorder %s41_s11, %s41_s11 }
  0x2b   :  { %p585_p5 = scmp.ne.s32.totalorder %s41_s11, %s584_s20  ;;  %p590_p7 = scmp.lt.s32.totalorder %s584_s20, %s584_s20 }
  0x2d   :  { %p591_p8 = por %p590_p7, %p589_p6 }
  0x2f   :  { %p592_p9 = pnand %p591_p8, %p585_p5 }
  0x31   :  { %595 = shalt.err (!%p592_p9)
}
  0x32   :  { %s629_s0 = smov 64   ;;  %s630_s15 = smov 4  }
  0x33   :  { %46 = dma.hbm_to_vmem [thread:$0]  %s719_s2, 2048, %s41_s11, [#allocation6], %s629_s0, %s629_s0, %s630_s15  }
  0x34   :  { %618 = dma.done.wait [#allocation3], 256  }
  0x35   :  { %619 = vsyncadd [#allocation3], 4294967040 }
  0x36   :  { %620 = dma.done.wait [#allocation6], 4096  }
  0x37   :  { %621 = vsyncadd [#allocation6], 4294963200  ;;  %v631_v0 = vmov 0   ;;  %v486_v1 = vld [vmem:[#allocation5 + $0x4] ss:$8 sps:$4 sm:$0xff]   ;;  %v514_v16 = vld [vmem:[#allocation7 + $0x50] sm:$0xff]  }
  0x38   :  { %188 = vmatprep.mubr.bf16.mxu0 %v631_v0  ;;  %v488_v2 = vld [vmem:[#allocation5] ss:$8 sps:$4 sm:$0xff]   ;;  %156 = vmatprep.subr.bf16.mxu0 %v486_v1  ;;  %v489_v3 = vld [vmem:[#allocation5 + $0x14] ss:$8 sps:$4 sm:$0xff]   ;;  %v491_v4 = vld [vmem:[#allocation5 + $0x10] ss:$8 sps:$4 sm:$0xff]  }
  0x39   :  { %157 = vmatpush1.bf16.msra.mxu0 %v488_v2  ;;  %v492_v5 = vld [vmem:[#allocation5 + $0x24] ss:$8 sps:$4 sm:$0xff]   ;;  %v494_v6 = vld [vmem:[#allocation5 + $0x20] ss:$8 sps:$4 sm:$0xff]   ;;  %v495_v7 = vld [vmem:[#allocation5 + $0x34] ss:$8 sps:$4 sm:$0xff]  }
  0x3a   :  { %158 = vmatprep.subr.bf16.mxu0 %v489_v3  ;;  %v497_v8 = vld [vmem:[#allocation5 + $0x30] ss:$8 sps:$4 sm:$0xff]   ;;  %v498_v9 = vld [vmem:[#allocation5 + $0x44] ss:$8 sps:$4 sm:$0xff]   ;;  %v500_v11 = vld [vmem:[#allocation5 + $0x40] ss:$8 sps:$4 sm:$0xff]  }
  0x3b   :  { %v510_v10 = vld [vmem:[#allocation7 + $0x40] sm:$0xff]   ;;  %v501_v13 = vld [vmem:[#allocation5 + $0x54] ss:$8 sps:$4 sm:$0xff]   ;;  %v512_v14 = vld [vmem:[#allocation7 + $0x48] sm:$0xff]   ;;  %s632_s2 = smov [#allocation8]  }
  0x3c   :  { %v511_v12 = vld [vmem:[#allocation7] sm:$0xff]   ;;  %455 = vmatprep.subr.bf16.mxu1 %v510_v10  ;;  %v513_v15 = vld [vmem:[#allocation7 + $0x8] sm:$0xff]   ;;  %v503_v17 = vld [vmem:[#allocation5 + $0x50] ss:$8 sps:$4 sm:$0xff]   ;;  %s410_s23 = sshll.u32 %s632_s2, 4  ;;  %s411_s23 = int_to_ptr.vmem [resolvable:$true] %s410_s23 }
  0x3d   :  { %159 = vmatpush1.bf16.msra.mxu0 %v491_v4  ;;  %456 = vmatpush3.bf16.msra.mxu1 %v511_v12  ;;  %v504_v18 = vld [vmem:[#allocation5 + $0x64] ss:$8 sps:$4 sm:$0xff]   ;;  %v515_v19 = vld [vmem:[#allocation7 + $0x10] sm:$0xff]   ;;  %v516_v20 = vld [vmem:[#allocation7 + $0x58] sm:$0xff]   ;;  %s596_s26 = scalar_lea.vmem %s411_s23, 256  ;;  %p601_p11 = scmp.lt.s32.totalorder %s411_s23, %s411_s23 }
  0x3e   :  { %160 = vmatprep.subr.bf16.mxu0 %v492_v5  ;;  %457 = vmatprep.subr.bf16.mxu1 %v512_v14  ;;  %v506_v21 = vld [vmem:[#allocation5 + $0x60] ss:$8 sps:$4 sm:$0xff]   ;;  %v507_v22 = vld [vmem:[#allocation5 + $0x74] ss:$8 sps:$4 sm:$0xff]   ;;  %v509_v25 = vld [vmem:[#allocation5 + $0x70] ss:$8 sps:$4 sm:$0xff]   ;;  %p597_p10 = scmp.ne.s32.totalorder %s411_s23, %s596_s26  ;;  %p602_p12 = scmp.lt.s32.totalorder %s596_s26, %s596_s26 }
  0x3f   :  { %v517_v23 = vld [vmem:[#allocation7 + $0x18] sm:$0xff]   ;;  %v518_v24 = vld [vmem:[#allocation7 + $0x60] sm:$0xff]   ;;  %v57_v26 = vld [vmem:[#allocation2] sm:$0xff] }
  0x40   :  { %v58_v27 = vld [vmem:[#allocation2 + $0x8] sm:$0xff]  ;;  %v519_v28 = vld [vmem:[#allocation7 + $0x20] sm:$0xff]   ;;  %v520_v29 = vld [vmem:[#allocation7 + $0x68] sm:$0xff]   ;;  %p603_p13 = por %p602_p12, %p601_p11 }
  0x41   :  { %161 = vmatpush1.bf16.msra.mxu0 %v494_v6  ;;  %458 = vmatpush3.bf16.msra.mxu1 %v513_v15  ;;  %v59_v30 = vpack.c.bf16 %v58_v27, %v57_v26  ;;  %v521_v31 = vld [vmem:[#allocation7 + $0x28] sm:$0xff]   ;;  %v522_v32 = vld [vmem:[#allocation7 + $0x70] sm:$0xff]   ;;  %v524_v34 = vld [vmem:[#allocation7 + $0x78] sm:$0xff]  }
  0x42   :  { %162 = vmatprep.subr.bf16.mxu0 %v495_v7  ;;  %459 = vmatprep.subr.bf16.mxu1 %v514_v16  ;;  %v523_v33 = vld [vmem:[#allocation7 + $0x30] sm:$0xff]   ;;  %v525_v35 = vld [vmem:[#allocation7 + $0x38] sm:$0xff]   ;;  %p604_p0 = pnand %p603_p13, %p597_p10 }
  0x45   :  { %163 = vmatpush1.bf16.msra.mxu0 %v497_v8  ;;  %460 = vmatpush3.bf16.msra.mxu1 %v515_v19 }
  0x46   :  { %164 = vmatprep.subr.bf16.mxu0 %v498_v9  ;;  %461 = vmatprep.subr.bf16.mxu1 %v516_v20 }
  0x49   :  { %165 = vmatpush1.bf16.msra.mxu0 %v500_v11  ;;  %462 = vmatpush3.bf16.msra.mxu1 %v517_v23 }
  0x4a   :  { %166 = vmatprep.subr.bf16.mxu0 %v501_v13  ;;  %463 = vmatprep.subr.bf16.mxu1 %v518_v24 }
  0x4d   :  { %167 = vmatpush1.bf16.msra.mxu0 %v503_v17  ;;  %464 = vmatpush3.bf16.msra.mxu1 %v519_v28 }
  0x4e   :  { %168 = vmatprep.subr.bf16.mxu0 %v504_v18  ;;  %465 = vmatprep.subr.bf16.mxu1 %v520_v29 }
  0x51   :  { %169 = vmatpush1.bf16.msra.mxu0 %v506_v21  ;;  %466 = vmatpush3.bf16.msra.mxu1 %v521_v31 }
  0x52   :  { %170 = vmatprep.subr.bf16.mxu0 %v507_v22  ;;  %467 = vmatprep.subr.bf16.mxu1 %v522_v32 }
  0x55   :  { %171 = vmatpush1.bf16.msra.mxu0 %v509_v25  ;;  %468 = vmatpush3.bf16.msra.mxu1 %v523_v33 }
  0x56   :  { %469 = vmatprep.subr.bf16.mxu1 %v524_v34 }
  0x58   :  { %189 = vmatmul.mubr.bf16.vlgmr.msra.gmra.mrb[0].mxu0 %v59_v30 }
  0x59   :  { %470 = vmatpush3.bf16.msra.mxu1 %v525_v35 }
 0x12b   :  { %v190_v36 = vpop.f32.mrb[0].mxu0 }
 0x12c   :  { %v192_v37 = vpop.f32.mrb[1].mxu0  ;;  %v199_v39 = vmax.f32 %v190_v36, 0.0 }
 0x12d   :  { %v194_v38 = vpop.f32.mrb[2].mxu0  ;;  %v200_v42 = vmax.f32 %v192_v37, 0.0 }
 0x12e   :  { %v201_v40 = vmax.f32 %v194_v38, 0.0  ;;  %v196_v41 = vpop.f32.mrb[3].mxu0 }
 0x12f   :  { %v202_v43 = vmax.f32 %v196_v41, 0.0 }
 0x130   :  { %v203_v44 = vpack.c.bf16 %v201_v40, %v199_v39 }
 0x131   :  { %v204_v45 = vpack.c.bf16 %v202_v43, %v200_v42 }
 0x133   :  { %365 = vmatprep.mubr.bf16.mxu1 %v204_v45 }
 0x134   :  { %366 = vmatmul.mubr.bf16.vlgmr.msra.gmra.mrb[0].mxu1 %v203_v44 }
 0x207   :  { %v471_v46 = vpop.f32.mrb[0].mxu1 }
 0x208   :  { %v472_v47 = vpop.f32.mrb[1].mxu1 }
 0x209   :  { %v473_v48 = vadd.f32 %v472_v47, %v471_v46  ;;  %v474_v49 = vpop.f32.mrb[2].mxu1 }
 0x20a   :  { %v475_v50 = vpop.f32.mrb[3].mxu1 }
 0x20b   :  { %v368_v51 = vadd.f32 %v473_v48, %v57_v26  ;;  %v476_v52 = vadd.f32 %v475_v50, %v474_v49 }
 0x20d   :  { %v371_v53 = vadd.f32 %v476_v52, %v58_v27  ;;  %374 = vadd.xlane.f32.xlu0 %v368_v51  ;;  %v381_v54 = vmul.f32 %v368_v51, %v368_v51 }
 0x20f   :  { %383 = vadd.xlane.f32.xlu1 %v381_v54  ;;  %v382_v55 = vmul.f32 %v371_v53, %v371_v53 }
 0x211   :  { %376 = vadd.xlane.f32.xlu0 %v371_v53 }
 0x213   :  { %385 = vadd.xlane.f32.xlu1 %v382_v55 }
 0x29a   :  { %v375_v56 = vpop.xlane.xlu0 %374 }
 0x29b   :  { %v379_v57 = vmul.f32 0.0078125, %v375_v56 }
 0x29c   :  { %v384_v58 = vpop.xlane.xlu1 %383 }
 0x29d   :  { %v389_v59 = vmul.f32 %v379_v57, %v379_v57  ;;  %v387_v60 = vmul.f32 0.0078125, %v384_v58  ;;  %v395_v8 = vsub.f32 %v368_v51, %v379_v57 }
 0x29e   :  { %v377_v61 = vpop.xlane.xlu0 %376 }
 0x29f   :  { %v391_v62 = vsub.f32 %v387_v60, %v389_v59  ;;  %v380_v63 = vmul.f32 0.0078125, %v377_v61 }
 0x2a0   :  { %v386_v0 = vpop.xlane.xlu1 %385 }
 0x2a1   :  { %v393_v1 = vmax.f32 %v391_v62, 0.0  ;;  %v390_v2 = vmul.f32 %v380_v63, %v380_v63  ;;  %v388_v3 = vmul.f32 0.0078125, %v386_v0  ;;  %v396_v11 = vsub.f32 %v371_v53, %v380_v63 }
 0x2a3   :  { %v397_v4 = vadd.f32 1e-05, %v393_v1  ;;  %v392_v5 = vsub.f32 %v388_v3, %v390_v2 }
 0x2a5   :  { %526 = vrsqrt.f32 %v397_v4  ;;  %v394_v6 = vmax.f32 %v392_v5, 0.0 }
 0x2a7   :  { %v398_v7 = vadd.f32 1e-05, %v394_v6 }
 0x2a9   :  { %528 = vrsqrt.f32 %v398_v7 }
 0x2af   :  { %v527_v9 = vpop.eup %526 }
 0x2b0   :  { %v401_v10 = vmul.f32 %v527_v9, %v395_v8 }
 0x2b2   :  { %403 = vst [vmem:[#allocation8] sm:$0xff] %v401_v10 }
 0x2b3   :  { %v529_v12 = vpop.eup %528 }
 0x2b4   :  { %v402_v13 = vmul.f32 %v529_v12, %v396_v11 }
 0x2b6   :  { %404 = vst [vmem:[#allocation8 + $0x8] sm:$0xff] %v402_v13 }
 0x2b7   :  { %607 = shalt.err (!%p604_p0)
}
 0x2b8   :  { %s608_s29 = scalar_lea.hbm %s720_s3, 256 }
 0x2b9   :  { %p609_p1 = scmp.ne.s32.totalorder %s720_s3, %s608_s29  ;;  %p612_p2 = scmp.lt.u32.totalorder %s608_s29, %s720_s3 }
 0x2bb   :  { %p614_p3 = pnand %p612_p2, %p609_p1 }
 0x2bd   :  { %617 = shalt.err (!%p614_p3)
}
 0x2be   :  { %416 = dma.vmem_to_hbm [thread:$0]  %s411_s23, 256, %s720_s3, [#allocation4], %s626_s24, %s626_s24, %s627_s25  }
 0x2bf   :  { %622 = dma.done.wait [#allocation4], 256  }
 0x2c0   :  { %623 = vsyncadd [#allocation4], 4294967040 }
 0x2c1   :  { %420 = vsyncpa [#allocation3], 1 }
 0x2c2   :  { %421 = vsyncpa [#allocation6], 1 }
 0x2c3   :  { %422 = vsyncpa [#allocation4], 1 }

</bundles_post_ra>
